<compile_context>
chip_gen: v6e
topology: v6e:2x2x1
jax: 0.10.0
libtpu: 0.0.40
codegen_flags: <defaults>
</compile_context>

<pallas_src>
import jax
import jax.numpy as jnp
from jax import lax
from jax.experimental import pallas as pl
from jax.experimental.pallas import tpu as pltpu


# ------------------------------- kernels -----------------------------------


def _fused_kernel(x_ones_ref, e_ref, a_ref, z_ref, g_scr):
    """Single streaming pass over one (N, tn) column tile of A.

    x_ones_ref : (D+1, N)  bf16  resident [E^T ; 1] (MXU LHS, fetched once)
    e_ref      : (D, tn)   f32   E^T tile (subtrahend for fstEmbeds)
    a_ref      : (N, tn)   int8  A column tile (0/1), upcast in-kernel
    z_ref      : (D+3, N)  f32   resident accumulator output:
                                 rows 0..D-1 = (A @ fstEmbeds)^T
                                 row  D      = A @ hi,  row D+1 = A @ lo
                                 row  D+2    = A @ 1 = order (exact)
    g_scr      : (D+3, tn) f32   scratch for the assembled G tile
    """
    j = pl.program_id(0)
    d = e_ref.shape[0]

    # int8 -> bf16 upcast right before the MXU (perf review item 2).
    a_bf = a_ref[...].astype(jnp.bfloat16)                      # (N, tn)

    # pass-1 for this tile's nodes: y = [E^T ; 1] @ A[:, tile]  -> (D+1, tn)
    y = jnp.dot(x_ones_ref[...], a_bf, preferred_element_type=jnp.float32)
    order = y[d:d + 1, :]                                       # exact f32 degrees

    # Assemble the G tile (feature-major).  Degrees are carried as an exact
    # hi/lo split (both exactly representable in bf16 for N <= 65536) plus a
    # ones row, so the bf16 matmul below reconstructs A@order / order exactly.
    hi = jnp.floor(order * (1.0 / 256.0))
    g_scr[0:d, :] = y[0:d, :] - e_ref[...]                      # fstEmbeds^T
    g_scr[d:d + 1, :] = hi
    g_scr[d + 1:d + 2, :] = order - 256.0 * hi
    g_scr[d + 2:d + 3, :] = jnp.ones_like(order)

    @pl.when(j == 0)
    def _():
        z_ref[...] = jnp.zeros_like(z_ref)

    # Z^T += G_tile @ A[:, tile]^T   (contract the tn axis of both operands --
    # the flash-attention QK^T pattern, so the big A tile is never relaid out).
    z_ref[...] += lax.dot_general(
        g_scr[...].astype(jnp.bfloat16), a_bf,
        (((1,), (1,)), ((), ())),
        preferred_element_type=jnp.float32)


def _epilogue_kernel(z_ref, e_ref, ess_ref, u_ref, s_ref):
    """Per-node score epilogue, one column tile of nodes (feature-major).

    z_ref   : (D+3, tn) f32   accumulator tile from the fused pass
    e_ref   : (D, tn)   f32   E^T tile
    ess_ref : (1, tn)   f32   precomputed sum(E*E) per node (review item 7)
    u_ref   : (1, tn)   f32   uniform noise tile
    s_ref   : (1, tn)   f32   out: Gumbel-perturbed log scores (lane dense)
    """
    d = e_ref.shape[0]
    z = z_ref[...]
    e = e_ref[...]

    order = z[d + 2:d + 3, :]                                    # A @ 1 (exact)
    a_order = 256.0 * z[d:d + 1, :] + z[d + 1:d + 2, :]          # A @ order (exact)

    # fstEmbeds + scdEmbeds = A@fstEmbeds - order*E ;  fstNum + scdNum = A@order - order
    num = z[0:d, :] - order * e                                  # (D, tn)
    den = a_order - order + 1e-8                                 # (1, tn)
    sub = num / den                                              # exact divide

    # F.normalize(p=2, eps=1e-12) for sub and E folded into the dot product.
    sub_ss = jnp.sum(sub * sub, axis=0, keepdims=True)
    dot = jnp.sum(sub * e, axis=0, keepdims=True)
    inv_norms = lax.rsqrt(jnp.maximum(sub_ss, 1e-24)) * lax.rsqrt(
        jnp.maximum(ess_ref[...], 1e-24))

    # makeNoise: log(sigmoid(dot)) + Gumbel(u)
    u = u_ref[...]
    u = jnp.where(u == 0.0, jnp.float32(1e-8), u)
    gumbel = -jnp.log(-jnp.log(u))
    s_ref[...] = jax.nn.log_sigmoid(dot * inv_norms) + gumbel


# ----------------------------- VMEM plumbing --------------------------------


def _vmem_capacity_bytes():
    """Physical VMEM per TensorCore; conservative 64 MiB if the query fails."""
    try:
        return int(pltpu.get_tpu_info().vmem_capacity_bytes)
    except Exception:
        return 64 * 1024 * 1024


def _kernel1_vmem_bytes(n, d, tn):
    """Estimated VMEM use of the fused kernel for a given column-tile width."""
    rows = d + 3
    a_tiles = 2 * n * tn * 1          # double-buffered int8 A column tile
    a_bf16 = n * tn * 2               # in-kernel bf16 upcast temp
    e_tiles = 2 * d * tn * 4          # double-buffered E^T tile
    x_res = 2 * (d + 1) * n * 2       # resident bf16 [E^T ; 1] (default 2 bufs;
                                      # pl.Buffered(1) would halve this on v7x)
    z_res = 2 * rows * n * 4          # resident f32 accumulator output
    scratch = rows * tn * 4           # G-tile scratch
    temps = 4 * rows * tn * 4         # y / bf16 G / staging slack
    return a_tiles + a_bf16 + e_tiles + x_res + z_res + scratch + temps


def _pick_tn(n, d, vmem_limit_bytes):
    """Largest column tile (multiple of 128 dividing N) fitting the budget."""
    budget = int(0.9 * vmem_limit_bytes)
    for cand in (2048, 1024, 512, 256, 128):
        if cand <= n and n % cand == 0 and _kernel1_vmem_bytes(n, d, cand) <= budget:
            return cand
    # TODO(synk): for N large enough that even a tn=128 full-height column tile
    # does not fit (N >~ 32K dense), fall back to a row-tiled two-sweep (A read
    # twice) or a sparse CSR formulation instead of a dense full-height column.
    return 128


# ------------------------------- wrapper ------------------------------------


def local_graph_forward(all_one_adj, embeds, noise_u, seed_num, *, tn=None):
    """Returns (scores (N,), seeds (seed_num,)) matching LocalGraph.forward.

    `all_one_adj` must be a symmetric 0/1 adjacency (as AutoCF's allOneAdj is);
    the fused single-read formulation relies on A == A^T.
    """
    N, D = embeds.shape
    assert all_one_adj.shape == (N, N)
    assert N % 128 == 0, "N must be a multiple of 128 (lane tiling)"
    assert N <= 65536, "exact hi/lo degree split assumes degrees <= 65536"
    rows = D + 3

    cap = _vmem_capacity_bytes()
    vmem_limit = max(32 * 1024 * 1024, min((cap * 3) // 4, 96 * 1024 * 1024))
    if tn is None:
        tn = _pick_tn(N, D, vmem_limit)
    assert N % tn == 0 and tn % 128 == 0

    # int8 adjacency in HBM (0/1 values are exact); upcast happens in-kernel.
    # (On v7x a float8_e4m3 A fed straight to the MXU would avoid even the VPU
    #  upcast -- left as a follow-up since mixed fp8 x bf16 support is chip/
    #  compiler dependent.)
    a_i8 = all_one_adj.astype(jnp.int8)

    e_t = jnp.asarray(embeds, jnp.float32).T                    # (D, N) feature-major
    x_ones = jnp.concatenate(                                    # (D+1, N) bf16 MXU LHS
        [e_t.astype(jnp.bfloat16), jnp.ones((1, N), jnp.bfloat16)], axis=0)
    e_ss = jnp.sum(e_t * e_t, axis=0, keepdims=True)             # (1, N) precomputed
    noise_row = jnp.asarray(noise_u, jnp.float32).reshape(1, N)

    grid = (N // tn,)

    # ---- fused single pass over A: Z^T = (A @ [fstEmbeds, hi, lo, 1])^T -----
    z = pl.pallas_call(
        _fused_kernel,
        out_shape=jax.ShapeDtypeStruct((rows, N), jnp.float32),
        grid=grid,
        in_specs=[
            pl.BlockSpec((D + 1, N), lambda j: (0, 0)),   # resident [E^T ; 1]
            pl.BlockSpec((D, tn), lambda j: (0, j)),      # E^T tile
            pl.BlockSpec((N, tn), lambda j: (0, j)),      # int8 A column tile
        ],
        out_specs=pl.BlockSpec((rows, N), lambda j: (0, 0)),     # resident acc
        scratch_shapes=[pltpu.VMEM((rows, tn), jnp.float32)],
        compiler_params=pltpu.CompilerParams(
            dimension_semantics=("arbitrary",),           # accumulation axis
            vmem_limit_bytes=vmem_limit),
        cost_estimate=pl.CostEstimate(
            flops=int(2 * (D + 1) * N * N + 2 * rows * N * N),
            transcendentals=0,
            bytes_accessed=int(N * N * 1 + (D + 1) * N * 2
                               + D * N * 4 + rows * N * 4),
        ),
    )(x_ones, e_t, a_i8)

    # ---- tiny streaming epilogue: per-node scores ---------------------------
    scores_row = pl.pallas_call(
        _epilogue_kernel,
        out_shape=jax.ShapeDtypeStruct((1, N), jnp.float32),
        grid=grid,
        in_specs=[
            pl.BlockSpec((rows, tn), lambda j: (0, j)),
            pl.BlockSpec((D, tn), lambda j: (0, j)),
            pl.BlockSpec((1, tn), lambda j: (0, j)),
            pl.BlockSpec((1, tn), lambda j: (0, j)),
        ],
        out_specs=pl.BlockSpec((1, tn), lambda j: (0, j)),
        compiler_params=pltpu.CompilerParams(
            dimension_semantics=("parallel",),
            vmem_limit_bytes=vmem_limit),
        cost_estimate=pl.CostEstimate(
            flops=int(10 * D * N),
            transcendentals=int(8 * N),
            bytes_accessed=int(rows * N * 4 + D * N * 4 + 3 * N * 4),
        ),
    )(z, e_t, e_ss, noise_row)

    scores = scores_row[0]
    # torch.topk(scores, seed_num) -> module returns indices as seeds.
    _, seeds = jax.lax.top_k(scores, seed_num)
    return scores, seeds


# --------------------------- reference / demo --------------------------------


def _reference_scores(all_one_adj_f32, embeds, noise_u):
    """Pure-JAX f32 transcription of LocalGraph.forward (pre-topk)."""
    A, E = all_one_adj_f32, embeds
    order = jnp.sum(A, axis=-1, keepdims=True)
    fst = A @ E - E
    fst_num = order
    scd = A @ fst - fst - order * E
    scd_num = A @ fst_num - fst_num - order
    sub = (fst + scd) / (fst_num + scd_num + 1e-8)
    sub_n = sub / jnp.maximum(jnp.sqrt(jnp.sum(sub * sub, -1, keepdims=True)), 1e-12)
    e_n = E / jnp.maximum(jnp.sqrt(jnp.sum(E * E, -1, keepdims=True)), 1e-12)
    s = jax.nn.sigmoid(jnp.sum(sub_n * e_n, -1))
    u = jnp.where(noise_u == 0.0, 1e-8, noise_u)
    return jnp.log(s) - jnp.log(-jnp.log(u))


if __name__ == "__main__":
    N, D = 256, 32
    SEED_NUM = 8

    key = jax.random.PRNGKey(0)
    k_adj, k_emb, k_noise = jax.random.split(key, 3)

    # Synthetic symmetric all-one adjacency (no self loops), as AutoCF's
    # allOneAdj would be after densification.
    upper = (jax.random.uniform(k_adj, (N, N)) < 0.05).astype(jnp.float32)
    upper = jnp.triu(upper, k=1)
    all_one_adj = upper + upper.T

    embeds = jax.random.normal(k_emb, (N, D), dtype=jnp.float32) * 0.1

    # Uniform [0,1) noise standing in for torch.rand(...).cuda()
    # (the CUDA RNG stream itself is not reproducible; semantics match).
    noise_u = jax.random.uniform(k_noise, (N,), dtype=jnp.float32)

    # tn=128 forces a 2-tile grid at this small demo size so the fused
    # accumulation path is exercised; at real sizes leave tn=None (auto-pick).
    scores, seeds = local_graph_forward(all_one_adj, embeds, noise_u, SEED_NUM,
                                        tn=128)
    jax.block_until_ready((scores, seeds))

    ref_scores = _reference_scores(all_one_adj, embeds, noise_u)

    assert scores.shape == (N,) and scores.dtype == jnp.float32
    assert seeds.shape == (SEED_NUM,)
    assert bool(jnp.all(jnp.isfinite(scores)))
    # bf16 MXU operands (f32 accumulation, exact integer degrees) vs pure-f32
    # reference: loose tolerance for the bf16-rounded embedding path.
    assert bool(jnp.allclose(scores, ref_scores, atol=1e-1, rtol=0.0))

    print("KERNEL_OK")
</pallas_src>

<mosaic_0001>
module attributes {stable_mosaic.version = 11 : i64} {
  func.func @_fused_kernel(%arg0: i32, %arg1: memref<33x256xbf16, #tpu.memory_space<vmem>>, %arg2: memref<32x128xf32, #tpu.memory_space<vmem>>, %arg3: memref<256x128xi8, #tpu.memory_space<vmem>>, %arg4: memref<35x256xf32, #tpu.memory_space<vmem>>, %arg5: memref<35x128xf32, #tpu.memory_space<vmem>>) attributes {dimension_semantics = [#tpu.dimension_semantics<arbitrary>], iteration_bounds = array<i64: 2>, scalar_prefetch = 0 : i64, scratch_operands = 1 : i64, tpu.core_type = #tpu.core_type<tc>, window_params = [{pipeline_mode = #tpu.pipeline_mode<synchronous>, transform_indices = @transform_0, window_bounds = array<i64: 33, 256>}, {transform_indices = @transform_1, window_bounds = array<i64: 32, 128>}, {transform_indices = @transform_2, window_bounds = array<i64: 256, 128>}, {pipeline_mode = #tpu.pipeline_mode<synchronous>, transform_indices = @transform_3, window_bounds = array<i64: 35, 256>}]} {
    %c0 = arith.constant 0 : index
    %c0_0 = arith.constant 0 : index
    %0 = vector.load %arg3[%c0, %c0_0] : memref<256x128xi8, #tpu.memory_space<vmem>>, vector<256x128xi8>
    %1 = arith.sitofp %0 : vector<256x128xi8> to vector<256x128xbf16>
    %c0_1 = arith.constant 0 : index
    %c0_2 = arith.constant 0 : index
    %2 = vector.load %arg1[%c0_1, %c0_2] : memref<33x256xbf16, #tpu.memory_space<vmem>>, vector<33x256xbf16>
    %cst = arith.constant dense<0.000000e+00> : vector<33x128xf32>
    %3 = tpu.matmul %2, %1, %cst {dimension_numbers = #tpu.dot_dimension_numbers<[1], [0], [0], [1], [0, 0, 1, 1], [], []>} : vector<33x256xbf16>, vector<256x128xbf16>, vector<33x128xf32> -> vector<33x128xf32>
    %4 = vector.extract_strided_slice %3 {offsets = [32, 0], sizes = [1, 128], strides = [1, 1]} : vector<33x128xf32> to vector<1x128xf32>
    %cst_3 = arith.constant 3.906250e-03 : f32
    %5 = vector.broadcast %cst_3 : f32 to vector<1x128xf32>
    %6 = arith.mulf %4, %5 : vector<1x128xf32>
    %7 = math.floor %6 : vector<1x128xf32>
    %8 = vector.extract_strided_slice %3 {offsets = [0, 0], sizes = [32, 128], strides = [1, 1]} : vector<33x128xf32> to vector<32x128xf32>
    %c0_4 = arith.constant 0 : index
    %c0_5 = arith.constant 0 : index
    %9 = vector.load %arg2[%c0_4, %c0_5] : memref<32x128xf32, #tpu.memory_space<vmem>>, vector<32x128xf32>
    %10 = arith.subf %8, %9 : vector<32x128xf32>
    %c0_6 = arith.constant 0 : index
    %c0_7 = arith.constant 0 : index
    %11 = vector.load %arg5[%c0_6, %c0_7] : memref<35x128xf32, #tpu.memory_space<vmem>>, vector<32x128xf32>
    tpu.vector_store %arg5[%c0_6, %c0_7], %10 {strides = array<i32>} : memref<35x128xf32, #tpu.memory_space<vmem>>, vector<32x128xf32>,
    %c32 = arith.constant 32 : index
    %c0_8 = arith.constant 0 : index
    %12 = vector.load %arg5[%c32, %c0_8] : memref<35x128xf32, #tpu.memory_space<vmem>>, vector<1x128xf32>
    tpu.vector_store %arg5[%c32, %c0_8], %7 {strides = array<i32>} : memref<35x128xf32, #tpu.memory_space<vmem>>, vector<1x128xf32>,
    %cst_9 = arith.constant 2.560000e+02 : f32
    %13 = vector.broadcast %cst_9 : f32 to vector<1x128xf32>
    %14 = arith.mulf %13, %7 : vector<1x128xf32>
    %15 = arith.subf %4, %14 : vector<1x128xf32>
    %c33 = arith.constant 33 : index
    %c0_10 = arith.constant 0 : index
    %16 = vector.load %arg5[%c33, %c0_10] : memref<35x128xf32, #tpu.memory_space<vmem>>, vector<1x128xf32>
    tpu.vector_store %arg5[%c33, %c0_10], %15 {strides = array<i32>} : memref<35x128xf32, #tpu.memory_space<vmem>>, vector<1x128xf32>,
    %cst_11 = arith.constant 1.000000e+00 : f32
    %17 = vector.broadcast %cst_11 : f32 to vector<1x128xf32>
    %c34 = arith.constant 34 : index
    %c0_12 = arith.constant 0 : index
    %18 = vector.load %arg5[%c34, %c0_12] : memref<35x128xf32, #tpu.memory_space<vmem>>, vector<1x128xf32>
    tpu.vector_store %arg5[%c34, %c0_12], %17 {strides = array<i32>} : memref<35x128xf32, #tpu.memory_space<vmem>>, vector<1x128xf32>,
    %c0_i32 = arith.constant 0 : i32
    %19 = arith.cmpi eq, %arg0, %c0_i32 : i32
    %20 = arith.extui %19 : i1 to i32
    %c0_i32_13 = arith.constant 0 : i32
    %21 = arith.cmpi ne, %20, %c0_i32_13 : i32
    scf.if %21 {
      %cst_21 = arith.constant 0.000000e+00 : f32
      %28 = vector.broadcast %cst_21 : f32 to vector<35x256xf32>
      %c0_22 = arith.constant 0 : index
      %c0_23 = arith.constant 0 : index
      %29 = vector.load %arg4[%c0_22, %c0_23] : memref<35x256xf32, #tpu.memory_space<vmem>>, vector<35x256xf32>
      tpu.vector_store %arg4[%c0_22, %c0_23], %28 {strides = array<i32>} : memref<35x256xf32, #tpu.memory_space<vmem>>, vector<35x256xf32>,
    } else {
    }
    %c0_14 = arith.constant 0 : index
    %c0_15 = arith.constant 0 : index
    %22 = vector.load %arg4[%c0_14, %c0_15] : memref<35x256xf32, #tpu.memory_space<vmem>>, vector<35x256xf32>
    %c0_16 = arith.constant 0 : index
    %c0_17 = arith.constant 0 : index
    %23 = vector.load %arg5[%c0_16, %c0_17] : memref<35x128xf32, #tpu.memory_space<vmem>>, vector<35x128xf32>
    %24 = arith.truncf %23 : vector<35x128xf32> to vector<35x128xbf16>
    %cst_18 = arith.constant dense<0.000000e+00> : vector<35x256xf32>
    %25 = tpu.matmul %24, %1, %cst_18 {dimension_numbers = #tpu.dot_dimension_numbers<[1], [1], [0], [0], [0, 0, 1, 0], [], []>} : vector<35x128xbf16>, vector<256x128xbf16>, vector<35x256xf32> -> vector<35x256xf32>
    %26 = arith.addf %22, %25 : vector<35x256xf32>
    %c0_19 = arith.constant 0 : index
    %c0_20 = arith.constant 0 : index
    %27 = vector.load %arg4[%c0_19, %c0_20] : memref<35x256xf32, #tpu.memory_space<vmem>>, vector<35x256xf32>
    tpu.vector_store %arg4[%c0_19, %c0_20], %26 {strides = array<i32>} : memref<35x256xf32, #tpu.memory_space<vmem>>, vector<35x256xf32>,
    return
  }
  func.func @transform_0(%arg0: i32) -> (i32, i32) {
    %c0_i32 = arith.constant 0 : i32
    %c0_i32_0 = arith.constant 0 : i32
    %c0_i32_1 = arith.constant 0 : i32
    return %c0_i32, %c0_i32_0 : i32, i32
  }
  func.func @transform_1(%arg0: i32) -> (i32, i32) {
    %c0_i32 = arith.constant 0 : i32
    %c0_i32_0 = arith.constant 0 : i32
    return %c0_i32, %arg0 : i32, i32
  }
  func.func @transform_2(%arg0: i32) -> (i32, i32) {
    %c0_i32 = arith.constant 0 : i32
    %c0_i32_0 = arith.constant 0 : i32
    return %c0_i32, %arg0 : i32, i32
  }
  func.func @transform_3(%arg0: i32) -> (i32, i32) {
    %c0_i32 = arith.constant 0 : i32
    %c0_i32_0 = arith.constant 0 : i32
    %c0_i32_1 = arith.constant 0 : i32
    return %c0_i32, %c0_i32_0 : i32, i32
  }
}

</mosaic_0001>

<bundles_post_ra>
// kernel: tpu_custom_call.1
= control target key start
LH: loop header
LB: loop body
LE: loop exit
PB: predicated region body
PF: predicated region fallthrough
CT: control target
= control target key end

     0   :  { %8 = vsyncpa [#allocation4], 0  ;;  %s1203_s0 = inlined_call_operand.hbm [shape: bf16[33,256], index: 0, kind: input, shape index: {}]   ;;  %s1204_s1 = inlined_call_operand.hbm [shape: f32[32,256], index: 1, kind: input, shape index: {}]   ;;  %s1205_s2 = inlined_call_operand.hbm [shape: s8[256,256], index: 2, kind: input, shape index: {}]   ;;  %s1206_s3 = inlined_call_operand.hbm [shape: f32[35,256], index: 3, kind: output, shape index: {}]  }
   0x1   :  { %9 = vsyncpa [#allocation7], 0 }
   0x2   :  { %11 = vsyncpa [#allocation7 + $0x1], 0 }
   0x3   :  { %12 = vsyncpa [#allocation5], 0  ;;  %s900_s12 = smov 0   ;;  %s902_s13 = smov 0  }
   0x4   :  { %s904_s14 = smov 0   ;;  %s906_s15 = smov 0  }
   0x5 LB: > { %s921_s16 = sadd.s32 1, %s867_s15   ;;  %s46_s17 = sadd.s32 1, %s863_s14  ;;  %s867_s15 = sphi %s906_s15, %s1221_s15   ;;  %s863_s14 = sphi %s904_s14, %s1220_s14   ;;  %s859_s13 = sphi %s902_s13, %s1219_s13   ;;  %s855_s12 = sphi %s900_s12, %s1218_s12  }
   0x6   : > { %s43_s18 = ssub.s32 %s867_s15, %s921_s16  ;;  %p53_p0 = scmp.ne.s32.totalorder %s863_s14, %s859_s13 }
   0x7   : > { %p44_p1 = scmp.eq.s32.totalorder %s43_s18, 0  ;;  %p54_p2 = scmp.eq.s32.totalorder %s867_s15, 0 }
   0x8   : > { %p666_p4 = scmp.lt.s32.totalorder %s867_s15, 2  ;;  %s143_s20 = sand.u32 1, %s867_s15  }
   0x9   : > { %s930_s19 = scalar_select %p44_p1, %s863_s14, %s46_s17  }
   0xa   : > { %p55_p3 = por %p54_p2, %p53_p0  ;;  %s145_s21 = sand.u32 1, %s863_s14  }
   0xb   : > { %s567_s22 = sshll.u32 %s145_s21, 5  ;;  %s568_s23 = sshll.u32 %s867_s15, 7 }
   0xc   : > { %s941_s26 = scalar_lea.hbm %s1204_s1, %s568_s23  ;;  %s147_s27 = scalar_lea.vmem [#allocation6], %s567_s22 }
   0xd   : > { %s153_s28 = sshll.u32 %s147_s27, 4  ;;  %p943_p5 = pnand %p666_p4, %p55_p3  ;;  %s947_s28 = int_to_ptr.vmem [resolvable:$true] %s153_s28 }
   0xe   : > { %s949_s30 = sshll.u32 %s145_s21, 6  ;;  %s951_s4 = scalar_lea.sflag [#allocation7], %s143_s20 }
   0xf   : > { %s719_s5 = scalar_lea.hbm %s941_s26, 512  ;;  %p721_p7 = pneg %p943_p5 }
  0x10   : > { %p720_p6 = scmp.ne.s32.totalorder %s941_s26, %s719_s5  ;;  %s724_s8 = scalar_lea.hbm %s1204_s1, 1024 }
  0x11   : > { %p725_p10 = scmp.lt.s32.totalorder %s941_s26, %s1204_s1  ;;  %p726_p11 = scmp.lt.s32.totalorder %s724_s8, %s719_s5 }
  0x12   : > { %p722_p8 = pnand %p721_p7, %p720_p6 }
  0x13   : > { %p727_p12 = por %p726_p11, %p725_p10 }
  0x14   : > { %p723_p9 = pneg %p722_p8 }
  0x16   : > { %p728_p13 = pnand %p727_p12, %p723_p9 }
  0x18   : > { %731 = shalt.err (!%p728_p13)
}
  0x19   : > { %s732_s11 = scalar_lea.vmem %s947_s28, 512  ;;  %s869_s17 = smov [#allocation6]  }
  0x1a   : > { %p733_p0 = scmp.ne.s32.totalorder %s947_s28, %s732_s11  ;;  %s737_s18 = sshll.u32 %s869_s17, 4  ;;  %s738_s18 = int_to_ptr.vmem [resolvable:$false] %s737_s18 }
  0x1b   : > { %s739_s20 = scalar_lea.vmem %s738_s18, 1024  ;;  %p740_p3 = scmp.lt.s32.totalorder %s947_s28, %s738_s18 }
  0x1c   : > { %p735_p1 = pnand %p733_p0, %p721_p7  ;;  %p741_p4 = scmp.lt.s32.totalorder %s739_s20, %s732_s11 }
  0x1e   : > { %p736_p2 = pneg %p735_p1  ;;  %p742_p6 = por %p741_p4, %p740_p3 }
  0x20   : > { %p743_p8 = pnand %p742_p6, %p736_p2 }
  0x22   : > { %746 = shalt.err (!%p743_p8)
}
  0x23   : > { %s870_s21 = smov 256   ;;  %s871_s22 = smov 128  }
  0x24   : > { %s872_s24 = smov 8   ;;  %s986_s5 = scalar_lea.hbm %s1205_s2, %s568_s23 }
  0x25   : > { %661 = dma.hbm_to_vmem [thread:$0]  (!%p943_p5), %s941_s26, 512, %s947_s28, %s951_s4, %s870_s21, %s871_s22, %s872_s24  }
  0x26   : > { %s167_s6 = scalar_lea.vmem [#allocation8], %s949_s30  ;;  %s990_s8 = sadd.s32 4294967295, %s867_s15  }
  0x27   : > { %s173_s7 = sshll.u32 %s167_s6, 4  ;;  %p59_p9 = scmp.ne.s32.totalorder %s859_s13, %s855_s12  ;;  %s1004_s7 = int_to_ptr.vmem [resolvable:$true] %s173_s7 }
  0x28   : > { %p1207_p10 = scmp.eq.s32.totalorder %s990_s8, 0  ;;  %p564_p11 = scmp.ge.s32.totalorder %s867_s15, 1 }
  0x29   : > { %p117_p12 = scmp.lt.s32.totalorder %s867_s15, 3  ;;  %s873_s28 = smov [#allocation3]  }
  0x2a   : > { %p1000_p0 = por %p1207_p10, %p59_p9  ;;  %s1010_s30 = sshll.u32 %s873_s28, 4  ;;  %s130_s30 = int_to_ptr.vmem [resolvable:$true] %s1010_s30 }
  0x2b   : > { %p1006_p1 = pnand %p564_p11, %p117_p12  ;;  %s747_s12 = scalar_lea.hbm %s986_s5, 1024 }
  0x2c   : > { %s1210_s23 = scalar_select %p1000_p0, 1, 0 }
  0x2d   : > { %p748_p3 = scmp.ne.s32.totalorder %s986_s5, %s747_s12  ;;  %s752_s10 = scalar_lea.hbm %s1205_s2, 2048 }
  0x2e   : > { %p753_p8 = scmp.lt.s32.totalorder %s986_s5, %s1205_s2  ;;  %p754_p9 = scmp.lt.s32.totalorder %s752_s10, %s747_s12 }
  0x2f   : > { %p750_p4 = pnand %p748_p3, %p721_p7 }
  0x30   : > { %p755_p11 = por %p754_p9, %p753_p8 }
  0x31   : > { %p751_p6 = pneg %p750_p4 }
  0x33   : > { %p756_p12 = pnand %p755_p11, %p751_p6 }
  0x35   : > { %759 = shalt.err (!%p756_p12)
}
  0x36   : > { %s760_s18 = scalar_lea.vmem %s1004_s7, 1024  ;;  %s874_s20 = smov [#allocation8]  }
  0x37   : > { %p761_p13 = scmp.ne.s32.totalorder %s1004_s7, %s760_s18  ;;  %s765_s25 = sshll.u32 %s874_s20, 4  ;;  %s766_s25 = int_to_ptr.vmem [resolvable:$false] %s765_s25 }
  0x38   : > { %s767_s27 = scalar_lea.vmem %s766_s25, 2048  ;;  %p768_p2 = scmp.lt.s32.totalorder %s1004_s7, %s766_s25 }
  0x39   : > { %p763_p3 = pnand %p761_p13, %p721_p7  ;;  %p769_p10 = scmp.lt.s32.totalorder %s767_s27, %s760_s18 }
  0x3b   : > { %p764_p4 = pneg %p763_p3  ;;  %p770_p0 = por %p769_p10, %p768_p2 }
  0x3d   : > { %p771_p8 = pnand %p770_p0, %p764_p4 }
  0x3f   : > { %774 = shalt.err (!%p771_p8)
}
  0x40   : > { %664 = dma.hbm_to_vmem [thread:$0]  (!%p943_p5), %s986_s5, 1024, %s1004_s7, %s951_s4, %s870_s21, %s871_s22, %s872_s24  }
  0x41   : > { %p1212_p7 = scmp.eq.s32.totalorder %s990_s8, 0  ;;  %p1213_p13 = pneg %p1006_p1 }
  0x42   : > { %s786_s6 = scalar_lea.vmem %s130_s30, 640  ;;  %p794_p11 = scmp.lt.s32.totalorder %s130_s30, %s130_s30 }
  0x43   : > { %p655_p6 = pnand %p1213_p13, %p1212_p7  ;;  %p787_p0 = scmp.ne.s32.totalorder %s130_s30, %s786_s6 }
  0x44   : > { %p795_p12 = scmp.lt.s32.totalorder %s786_s6, %s786_s6 }
  0x45   : > { %p777_p10 = pneg %p655_p6 }
  0x46   : > { %p796_p3 = por %p795_p12, %p794_p11 }
  0x47   : > { %p789_p2 = pnand %p787_p0, %p777_p10 }
  0x49   : > { %p790_p9 = pneg %p789_p2 }
  0x4b   : > { %p797_p4 = pnand %p796_p3, %p790_p9 }
  0x4d   : > { %800 = shalt.err (!%p797_p4)
}
  0x4e   : > { %657 = dma.hbm_to_vmem [thread:$0]  (!%p655_p6), %s1203_s0, 640, %s130_s30, [#allocation4], %s871_s22, %s871_s22, %s872_s24  }
  0x4f   : > { %185 = sbr.rel (%p1006_p1) target bundleno = 639 (0x27f), region = 32  ;;  %p1214_p5 = scmp.eq.s32.totalorder (!%p1006_p1), %s990_s8, 0 }
  0x54   : > { %842 = dma.done.wait (%p1214_p5), [#allocation4], 640   ;;  %p1215_p8 = pmov %p1214_p5 }
  0x55   : > { %s191_s21 = sand.u32 1, %s990_s8   ;;  %s193_s5 = sand.u32 1, %s859_s13  }
  0x56   : > { %844 = vsyncadd (%p1215_p8), [#allocation4], 4294966656  ;;  %s573_s7 = sshll.u32 %s193_s5, 5  ;;  %s192_s28 = scalar_lea.sflag [#allocation7], %s191_s21 }
  0x57   : > { %s1060_s12 = scalar_lea.vmem [#allocation6], %s573_s7  ;;  %p1216_p7 = scmp.ne.s32.totalorder %s1210_s23, 0 }
  0x59   : > { %846 = dma.done.wait (%p1216_p7), %s192_s28, 1536  }
  0x5a   : > { %848 = vsyncadd (%p1216_p7), %s192_s28, 4294965760  ;;  %v875_v0 = vmov 1.0   ;;  %s574_s22 = sshll.u32 %s193_s5, 6  ;;  %v713_v7 = vld [vmem:[#allocation3 + $0x4] ss:$8 sps:$4 sm:$0xff]   ;;  %v343_v39 = vld [vmem:[%s1060_s12 + $0x8] sm:$0xff] }
  0x5b   : > { %358 = vst [vmem:[#allocation2 + $0x22] sm:$0x1] %v875_v0  ;;  %s1066_s24 = scalar_lea.vmem [#allocation8], %s574_s22  ;;  %316 = vmatprep.mubr.bf16.mxu0 %v713_v7  ;;  %v711_v26 = vld [vmem:[#allocation3] ss:$8 sps:$4 sm:$0xff]   ;;  %v344_v44 = vld [vmem:[%s1060_s12 + $0x10] sm:$0xff] }
  0x5c   : > { %v1069_v1 = vld [vmem:[%s1066_s24 + $0x38] sm:$0xff]  ;;  %v1078_v6 = vld [vmem:[%s1066_s24 + $0x30] sm:$0xff]  ;;  %v1098_v13 = vld [vmem:[%s1066_s24 + $0x28] sm:$0xff]  ;;  %p1217_p1 = scmp.ne.s32.totalorder %s990_s8, 0 }
  0x5d   : > { %v1072_v2 = vld [vmem:[%s1066_s24 + $0x18] sm:$0xff]  ;;  %v250_v3 = vunpack.c.l.s8.bf16 %v1069_v1  ;;  %v251_v4 = vunpack.c.h.s8.bf16 %v1069_v1  ;;  %v249_v9 = vunpack.c.h.s8.bf16 %v1078_v6  ;;  %v1089_v10 = vld [vmem:[%s1066_s24 + $0x10] sm:$0xff]  ;;  %v248_v12 = vunpack.c.l.s8.bf16 %v1078_v6  ;;  %v1107_v16 = vld [vmem:[%s1066_s24 + $0x8] sm:$0xff] }
  0x5e   : > { %v243_v5 = vunpack.c.h.s8.bf16 %v1072_v2  ;;  %v242_v8 = vunpack.c.l.s8.bf16 %v1072_v2  ;;  %v241_v11 = vunpack.c.h.s8.bf16 %v1089_v10  ;;  %v240_v14 = vunpack.c.l.s8.bf16 %v1089_v10  ;;  %v1116_v19 = vld [vmem:[%s1066_s24 + $0x20] sm:$0xff]  ;;  %v714_v27 = vld [vmem:[#allocation3 + $0x14] ss:$8 sps:$4 sm:$0xff]   ;;  %v256_v28 = vld [vmem:[#allocation3 + $0x20] sm:$0x11] }
  0x5f   : > { %586 = vmatprep.subr.bf16.mxu0 %v251_v4  ;;  %v247_v15 = vunpack.c.h.s8.bf16 %v1098_v13  ;;  %v239_v17 = vunpack.c.h.s8.bf16 %v1107_v16  ;;  %v246_v18 = vunpack.c.l.s8.bf16 %v1098_v13  ;;  %v238_v20 = vunpack.c.l.s8.bf16 %v1107_v16  ;;  %v1125_v22 = vld [vmem:[%s1066_s24] sm:$0xff]  ;;  %v716_v29 = vld [vmem:[#allocation3 + $0x10] ss:$8 sps:$4 sm:$0xff]   ;;  %v345_v49 = vld [vmem:[%s1060_s12 + $0x18] sm:$0xff] }
  0x60   : > { %587 = vmatpush3.bf16.msra.mxu0 %v243_v5  ;;  %v245_v21 = vunpack.c.h.s8.bf16 %v1116_v19  ;;  %v237_v23 = vunpack.c.h.s8.bf16 %v1125_v22  ;;  %v244_v24 = vunpack.c.l.s8.bf16 %v1116_v19  ;;  %v236_v25 = vunpack.c.l.s8.bf16 %v1125_v22  ;;  %v342_v34 = vld [vmem:[%s1060_s12] sm:$0xff] }
  0x61   : > { %588 = vmatprep.subr.bf16.mxu0 %v250_v3  ;;  %v580_v30 = vcombine.high %v256_v28, %v256_v28  ;;  %v579_v31 = vcombine.low %v256_v28, %v256_v28 }
  0x64   : > { %589 = vmatpush3.bf16.msra.mxu0 %v242_v8 }
  0x65   : > { %590 = vmatprep.subr.bf16.mxu0 %v249_v9 }
  0x68   : > { %591 = vmatpush3.bf16.msra.mxu0 %v241_v11 }
  0x69   : > { %592 = vmatprep.subr.bf16.mxu0 %v248_v12 }
  0x6c   : > { %593 = vmatpush3.bf16.msra.mxu0 %v240_v14 }
  0x6d   : > { %594 = vmatprep.subr.bf16.mxu0 %v247_v15 }
  0x70   : > { %595 = vmatpush3.bf16.msra.mxu0 %v239_v17 }
  0x71   : > { %596 = vmatprep.subr.bf16.mxu0 %v246_v18 }
  0x74   : > { %597 = vmatpush3.bf16.msra.mxu0 %v238_v20 }
  0x75   : > { %598 = vmatprep.subr.bf16.mxu0 %v245_v21 }
  0x78   : > { %599 = vmatpush3.bf16.msra.mxu0 %v237_v23 }
  0x79   : > { %600 = vmatprep.subr.bf16.mxu0 %v244_v24 }
  0x7c   : > { %601 = vmatpush3.bf16.msra.mxu0 %v236_v25 }
  0x7f   : > { %317 = vmatmul.mubr.bf16.vlgmr.msra.gmra.mxu0 %v711_v26 }
  0x80   : > { %324 = vmatprep.mubr.bf16.mxu0 %v714_v27 }
  0x87   : > { %325 = vmatmul.mubr.bf16.gmra.mxu0 %v716_v29 }
  0x88   : > { %332 = vmatprep.mubr.bf16.mxu0 %v580_v30 }
  0x8f   : > { %333 = vmatmul.mubr.bf16.gmra.mxu0 %v579_v31 }
 0x13f   : > { %v602_v32 = vpop.f32.mrf.mxu0 }
 0x141   : > { %v603_v33 = vpop.f32.mrf.mxu0 }
 0x142   : > { %v604_v35 = vadd.f32 %v603_v33, %v602_v32 }
 0x143   : > { %v605_v36 = vpop.f32.mrf.mxu0 }
 0x144   : > { %v346_v37 = vsub.f32 %v604_v35, %v342_v34 }
 0x145   : > { %v606_v38 = vpop.f32.mrf.mxu0 }
 0x146   : > { %350 = vst [vmem:[#allocation2] sm:$0xff] %v346_v37  ;;  %v607_v40 = vadd.f32 %v606_v38, %v605_v36 }
 0x147   : > { %v608_v41 = vpop.f32.mrf.mxu0 }
 0x148   : > { %v347_v42 = vsub.f32 %v607_v40, %v343_v39 }
 0x149   : > { %v609_v43 = vpop.f32.mrf.mxu0 }
 0x14a   : > { %351 = vst [vmem:[#allocation2 + $0x8] sm:$0xff] %v347_v42  ;;  %v610_v45 = vadd.f32 %v609_v43, %v608_v41 }
 0x14b   : > { %v611_v46 = vpop.f32.mrf.mxu0 }
 0x14c   : > { %v348_v47 = vsub.f32 %v610_v45, %v344_v44 }
 0x14d   : > { %v612_v48 = vpop.f32.mrf.mxu0 }
 0x14e   : > { %352 = vst [vmem:[#allocation2 + $0x10] sm:$0xff] %v348_v47  ;;  %v613_v50 = vadd.f32 %v612_v48, %v611_v46 }
 0x14f   : > { %v614_v51 = vpop.f32.mrf.mxu0 }
 0x150   : > { %v349_v52 = vsub.f32 %v613_v50, %v345_v49 }
 0x151   : > { %v615_v53 = vpop.f32.mrf.mxu0 }
 0x152   : > { %353 = vst [vmem:[#allocation2 + $0x18] sm:$0xff] %v349_v52  ;;  %v616_v54 = vadd.f32 %v615_v53, %v614_v51 }
 0x153   : > { %v617_v55 = vpop.f32.mrf.mxu0 }
 0x154   : > { %v340_v56 = vmul.f32 0.00390625, %v616_v54 }
 0x155   : > { %v618_v57 = vpop.f32.mrf.mxu0 }
 0x156   : > { %v341_v58 = vfloor.f32 %v340_v56 }
 0x158   : > { %354 = vst [vmem:[#allocation2 + $0x20] sm:$0x1] %v341_v58  ;;  %v355_v59 = vmul.f32 256.0, %v341_v58  ;;  %362 = sbr.rel (%p1217_p1) target bundleno = 355 (0x163), region = 48 }
 0x15a   : > { %v356_v60 = vsub.f32 %v616_v54, %v355_v59 }
 0x15c   : > { %357 = vst [vmem:[#allocation2 + $0x21] sm:$0x1] %v356_v60 }
 0x15d   : > { %v876_v61 = vmov 0.0  }
 0x15e   : > { %363 = vst [vmem:[#allocation9] sm:$0xff] %v876_v61  ;;  %364 = vst [vmem:[#allocation9 + $0x8] sm:$0xff] %v876_v61 }
 0x15f   : > { %365 = vst [vmem:[#allocation9 + $0x10] sm:$0xff] %v876_v61  ;;  %366 = vst [vmem:[#allocation9 + $0x18] sm:$0xff] %v876_v61 }
 0x160   : > { %367 = vst [vmem:[#allocation9 + $0x20] sm:$0xff] %v876_v61  ;;  %368 = vst [vmem:[#allocation9 + $0x28] sm:$0xff] %v876_v61 }
 0x161   : > { %369 = vst [vmem:[#allocation9 + $0x30] sm:$0xff] %v876_v61  ;;  %370 = vst [vmem:[#allocation9 + $0x38] sm:$0xff] %v876_v61 }
 0x162   : > { %371 = vst [vmem:[#allocation9 + $0x40] sm:$0x7] %v876_v61  ;;  %372 = vst [vmem:[#allocation9 + $0x48] sm:$0x7] %v876_v61 }
 0x163 PF: > { %620 = vmatprep.subr.bf16.mxu1 %v251_v4  ;;  %v383_v62 = vld [vmem:[#allocation2] sm:$0xff]  ;;  %v384_v63 = vld [vmem:[#allocation2 + $0x8] sm:$0xff]  ;;  %v385_v1 = vld [vmem:[#allocation2 + $0x10] sm:$0xff]  ;;  %s877_s23 = smov [#allocation9]   ;;  %p668_p13 = scmp.eq.s32.totalorder %s990_s8, 1 }
 0x164   : > { %621 = vmatpush3.bf16.xpose.msra.mxu1 %v243_v5  ;;  %v388_v0 = vpack.c.bf16 %v384_v63, %v383_v62  ;;  %v386_v2 = vld [vmem:[#allocation2 + $0x18] sm:$0xff]  ;;  %s478_s26 = sshll.u32 %s877_s23, 4  ;;  %s479_s26 = int_to_ptr.vmem [resolvable:$true] %s478_s26 }
 0x165   : > { %622 = vmatprep.subr.bf16.mxu1 %v250_v3  ;;  %v389_v3 = vpack.c.bf16 %v386_v2, %v385_v1  ;;  %v373_v6 = vld [vmem:[#allocation9] sm:$0xff]  ;;  %s801_s30 = scalar_lea.vmem %s479_s26, 1280  ;;  %p808_p2 = scmp.lt.s32.totalorder %s479_s26, %s479_s26 }
 0x166   : > { %636 = vmatprep.mubr.bf16.mxu1 %v388_v0  ;;  %p802_p6 = scmp.ne.s32.totalorder %s479_s26, %s801_s30  ;;  %p809_p9 = scmp.lt.s32.totalorder %s801_s30, %s801_s30 }
 0x168   : > { %v380_v26 = vld [vmem:[#allocation9 + $0x38] sm:$0xff]  ;;  %p803_p10 = pnand %p802_p6, %p668_p13  ;;  %p810_p11 = por %p809_p9, %p808_p2 }
 0x169   : > { %v387_v4 = vld [vmem:[#allocation2 + $0x20] sm:$0x7]  ;;  %v381_v29 = vld [vmem:[#allocation9 + $0x40] sm:$0x7]  ;;  %v382_v32 = vld [vmem:[#allocation9 + $0x48] sm:$0x7] }
 0x16a   : > { %v390_v5 = vpack.c.bf16 %v387_v4, %v387_v4  ;;  %p804_p0 = pneg %p803_p10 }
 0x16c   : > { %623 = vmatpush3.bf16.xpose.msra.mxu1 %v242_v8  ;;  %v374_v8 = vld [vmem:[#allocation9 + $0x8] sm:$0xff]  ;;  %p811_p12 = pnand %p810_p11, %p804_p0 }
 0x16d   : > { %624 = vmatprep.subr.bf16.mxu1 %v249_v9 }
 0x174   : > { %625 = vmatpush3.bf16.xpose.msra.mxu1 %v241_v11  ;;  %v375_v11 = vld [vmem:[#allocation9 + $0x10] sm:$0xff] }
 0x175   : > { %626 = vmatprep.subr.bf16.mxu1 %v248_v12 }
 0x17c   : > { %627 = vmatpush3.bf16.xpose.msra.mxu1 %v240_v14  ;;  %v376_v14 = vld [vmem:[#allocation9 + $0x18] sm:$0xff] }
 0x17d   : > { %628 = vmatprep.subr.bf16.mxu1 %v247_v15 }
 0x184   : > { %629 = vmatpush3.bf16.xpose.msra.mxu1 %v239_v17  ;;  %v377_v17 = vld [vmem:[#allocation9 + $0x20] sm:$0xff] }
 0x185   : > { %630 = vmatprep.subr.bf16.mxu1 %v246_v18 }
 0x18c   : > { %631 = vmatpush3.bf16.xpose.msra.mxu1 %v238_v20  ;;  %v378_v20 = vld [vmem:[#allocation9 + $0x28] sm:$0xff] }
 0x18d   : > { %632 = vmatprep.subr.bf16.mxu1 %v245_v21 }
 0x194   : > { %633 = vmatpush3.bf16.xpose.msra.mxu1 %v237_v23  ;;  %v379_v23 = vld [vmem:[#allocation9 + $0x30] sm:$0xff] }
 0x195   : > { %634 = vmatprep.subr.bf16.mxu1 %v244_v24 }
 0x19c   : > { %635 = vmatpush3.bf16.xpose.msra.mxu1 %v236_v25 }
 0x1a3   : > { %637 = vmatmul.mubr.bf16.vlgmr.msra.gmra.mxu1 %v388_v0 }
 0x1a4   : > { %638 = vmatprep.mubr.bf16.mxu1 %v389_v3 }
 0x1ab   : > { %639 = vmatmul.mubr.bf16.gmra.mxu1 %v389_v3 }
 0x1ac   : > { %640 = vmatprep.mubr.bf16.mxu1 %v390_v5 }
 0x1b3   : > { %641 = vmatmul.mubr.bf16.gmra.mxu1 %v390_v5 }
 0x263   : > { %v425_v7 = vpop.f32.mrf.mxu1 }
 0x264   : > { %v452_v9 = vadd.f32 %v425_v7, %v373_v6 }
 0x265   : > { %v427_v10 = vpop.f32.mrf.mxu1 }
 0x266   : > { %462 = vst [vmem:[#allocation9] sm:$0xff] %v452_v9  ;;  %v453_v12 = vadd.f32 %v427_v10, %v374_v8 }
 0x267   : > { %v429_v13 = vpop.f32.mrf.mxu1 }
 0x268   : > { %463 = vst [vmem:[#allocation9 + $0x8] sm:$0xff] %v453_v12  ;;  %v454_v15 = vadd.f32 %v429_v13, %v375_v11 }
 0x269   : > { %v431_v16 = vpop.f32.mrf.mxu1 }
 0x26a   : > { %464 = vst [vmem:[#allocation9 + $0x10] sm:$0xff] %v454_v15  ;;  %v455_v18 = vadd.f32 %v431_v16, %v376_v14 }
 0x26b   : > { %v435_v19 = vpop.f32.mrf.mxu1 }
 0x26c   : > { %465 = vst [vmem:[#allocation9 + $0x18] sm:$0xff] %v455_v18  ;;  %v456_v21 = vadd.f32 %v435_v19, %v377_v17 }
 0x26d   : > { %v437_v22 = vpop.f32.mrf.mxu1 }
 0x26e   : > { %466 = vst [vmem:[#allocation9 + $0x20] sm:$0xff] %v456_v21  ;;  %v457_v24 = vadd.f32 %v437_v22, %v378_v20 }
 0x26f   : > { %v439_v25 = vpop.f32.mrf.mxu1 }
 0x270   : > { %467 = vst [vmem:[#allocation9 + $0x28] sm:$0xff] %v457_v24  ;;  %v458_v27 = vadd.f32 %v439_v25, %v379_v23 }
 0x271   : > { %v441_v28 = vpop.f32.mrf.mxu1 }
 0x272   : > { %468 = vst [vmem:[#allocation9 + $0x30] sm:$0xff] %v458_v27  ;;  %v459_v30 = vadd.f32 %v441_v28, %v380_v26 }
 0x273   : > { %v445_v31 = vpop.f32.mrf.mxu1 }
 0x274   : > { %469 = vst [vmem:[#allocation9 + $0x38] sm:$0xff] %v459_v30  ;;  %v460_v33 = vadd.f32 %v445_v31, %v381_v29 }
 0x275   : > { %v447_v34 = vpop.f32.mrf.mxu1 }
 0x276   : > { %470 = vst [vmem:[#allocation9 + $0x40] sm:$0x7] %v460_v33  ;;  %v461_v35 = vadd.f32 %v447_v34, %v382_v32 }
 0x277   : > { %v449_v36 = vpop.f32.mrf.mxu1 }
 0x278   : > { %471 = vst [vmem:[#allocation9 + $0x48] sm:$0x7] %v461_v35 }
 0x279   : > { %v450_v37 = vpop.f32.mrf.mxu1 }
 0x27a   : > { %814 = shalt.err (!%p811_p12)
}
 0x27b   : > { %s878_s15 = smov 256   ;;  %s879_s9 = smov 16  }
 0x27c   : > { %651 = dma.vmem_to_hbm [thread:$0]  (%p668_p13), %s479_s26, 1280, %s1206_s3, [#allocation5], %s878_s15, %s878_s15, %s879_s9  }
 0x27d   : > { %850 = dma.done.wait (%p668_p13), [#allocation5], 1280  }
 0x27e   : > { %852 = vsyncadd (%p668_p13), [#allocation5], 4294966016 }
 0x27f PF: > { %p15_p3 = scmp.ge.s32.totalorder %s921_s16, 4   ;;  %s1218_s12 = smov %s859_s13 }
 0x280   : > { %s1219_s13 = smov %s863_s14  ;;  %s1220_s14 = smov %s930_s19 }
 0x281   : > { %s1221_s15 = smov %s921_s16  ;;  %17 = sbr.rel (!%p15_p3) target bundleno = 5 (0x5), region = 89 }
 0x286   :  { %494 = vsyncpa [#allocation4], 1 }
 0x287   :  { %496 = vsyncpa [#allocation4 + $0x1], 1 }
 0x288   :  { %497 = vsyncpa [#allocation7], 1 }
 0x289   :  { %499 = vsyncpa [#allocation7 + $0x1], 1 }
 0x28a   :  { %500 = vsyncpa [#allocation5], 1 }
 0x28b   :  { %502 = vsyncpa [#allocation5 + $0x1], 1 }

</bundles_post_ra>
